<compile_context>
chip_gen: v7x
topology: tpu7x:2x2x1
jax: 0.10.0
libtpu: 0.0.40
codegen_flags: <defaults>
</compile_context>

<pallas_src>
import functools

import numpy as np

import jax
import jax.numpy as jnp
from jax.experimental import pallas as pl
from jax.experimental.pallas import tpu as pltpu


def _lane_tile(x, reps):
    """Concatenate `reps` copies of x along the last (lane) axis.

    Log-doubling concat -> O(log reps) lane shift/select passes (XLU/VPU work,
    off the EUP).  All copies are identical, so chunk order is irrelevant.
    """
    out = None
    piece = x
    r = int(reps)
    while r > 0:
        if r & 1:
            out = piece if out is None else jnp.concatenate([out, piece], axis=-1)
        r >>= 1
        if r:
            piece = jnp.concatenate([piece, piece], axis=-1)
    return out


def _pos_emb_kernel(x_ref, scale_ref, o_ref, *, n_freqs, c):
    # x block: (tile_m, C)
    x = x_ref[...].astype(jnp.float32)

    # Compact (tile_m, N*C) argument slab: chunk i holds 2^i * x.
    # Powers of two -> the scaling is exact in f32 (bit-identical to freq*x).
    a = _lane_tile(x, n_freqs) * scale_ref[...]          # (tm, N*C)

    # One trig pass each over the compact slab only (no discarded lanes).
    s = jnp.sin(a)
    cc = jnp.cos(a)

    # Assemble PyTorch concat order [x, sin(f0 x), cos(f0 x), sin(f1 x), ...]
    # with static lane slices; identity lanes are raw x (never scaled/selected).
    pieces = [x]
    for i in range(n_freqs):
        lo = i * c
        pieces.append(s[:, lo:lo + c])
        pieces.append(cc[:, lo:lo + c])

    # Single lane-dense full-tile store (one (tm, C_out) slab, no narrow stores).
    o_ref[...] = jnp.concatenate(pieces, axis=-1).astype(o_ref.dtype)


def position_embedding(x, n_freqs=10, tile_m=2048):
    """Pallas implementation of PositionEmbedding.forward.

    x: array with last dim = in_channels.  Returns array with last dim
    in_channels * (2*n_freqs + 1); all leading dims preserved.  Output dtype
    matches the (floating) input dtype; non-float inputs are upcast to f32.
    """
    x = jnp.asarray(x)
    if not jnp.issubdtype(x.dtype, jnp.floating):
        x = x.astype(jnp.float32)
    out_dtype = x.dtype

    *lead, c = x.shape
    m = int(np.prod(lead)) if lead else 1
    c_out = c * (2 * n_freqs + 1)

    if n_freqs == 0:                      # degenerate case: identity
        return x

    x2 = x.reshape(m, c)

    # Per-lane frequency row for the compact argument slab:
    # scale[0, i*C + j] = 2^i  (exact powers of two in f32).  Tiny, resident in
    # VMEM across grid steps (constant index_map -> no re-DMA).
    exps = np.repeat(np.arange(n_freqs), c)
    scale = np.exp2(exps).astype(np.float32).reshape(1, n_freqs * c)

    # Tile selection:
    #  * large M tiles amortize the ~0.35us/step grid overhead,
    #  * but guarantee >=4 grid steps when m allows, so the "parallel" M axis can
    #    shard across both v7x TensorCores (free on single-TC v5e/v6e).
    if m > 8:
        target = -(-m // 4)                        # cdiv(m, 4)
        target = max(8, ((target + 7) // 8) * 8)   # sublane-align partial tiles
        tile = int(min(tile_m, target))
    else:
        tile = m
    grid = (pl.cdiv(m, tile),)   # ragged tail handled by Pallas boundary masking

    itemsize = jnp.dtype(out_dtype).itemsize
    cost = pl.CostEstimate(
        flops=3 * m * n_freqs * c,                 # scale-mul + assembly passes
        transcendentals=2 * m * n_freqs * c,       # sin + cos over the compact slab
        bytes_accessed=itemsize * m * (c + c_out),
    )

    out = pl.pallas_call(
        functools.partial(_pos_emb_kernel, n_freqs=n_freqs, c=c),
        out_shape=jax.ShapeDtypeStruct((m, c_out), out_dtype),
        grid_spec=pltpu.PrefetchScalarGridSpec(
            num_scalar_prefetch=0,
            grid=grid,
            in_specs=[
                pl.BlockSpec((tile, c), lambda i: (i, 0)),          # x rows
                pl.BlockSpec((1, n_freqs * c), lambda i: (0, 0)),   # freq scale row
            ],
            out_specs=pl.BlockSpec((tile, c_out), lambda i: (i, 0)),
        ),
        compiler_params=pltpu.CompilerParams(
            dimension_semantics=("parallel",),        # shards M across TCs on v7x
            vmem_limit_bytes=32 * 1024 * 1024,        # safe on v5e/v6e/v7x
        ),
        cost_estimate=cost,
    )(x2, jnp.asarray(scale))

    return out.reshape(*lead, c_out)


def position_embedding_ref(x, n_freqs=10):
    """Pure-JAX reference mirroring the PyTorch forward."""
    freq_bands = 2.0 ** jnp.linspace(0.0, n_freqs - 1, n_freqs)
    out = [x]
    for f in freq_bands:
        out.append(jnp.sin(f * x))
        out.append(jnp.cos(f * x))
    return jnp.concatenate(out, axis=-1)


if __name__ == "__main__":
    key = jax.random.PRNGKey(0)
    k1, k2 = jax.random.split(key)

    # Case 1: in_channels=8, N_freqs=10 -> out last dim 168.  m=64 rows ->
    # tile=16, 4 grid steps (exercises the multi-step / multi-TC path).
    in_channels, n_freqs = 8, 10
    x = jax.random.normal(k1, (2, 32, in_channels), dtype=jnp.float32)
    out = jax.block_until_ready(position_embedding(x, n_freqs=n_freqs))
    ref = position_embedding_ref(x, n_freqs=n_freqs)
    assert out.shape == (2, 32, in_channels * (2 * n_freqs + 1)), out.shape
    assert jnp.allclose(out, ref, atol=1e-5, rtol=1e-5), "case 1 mismatch vs reference"

    # Case 2: ragged M (65 rows, tile_m=32 -> tile 24, 3 grid steps, masked last
    # block), different N_freqs.  Exercises the cdiv-grid boundary path.
    x2 = jax.random.normal(k2, (5, 13, in_channels), dtype=jnp.float32)
    out2 = jax.block_until_ready(position_embedding(x2, n_freqs=6, tile_m=32))
    ref2 = position_embedding_ref(x2, n_freqs=6)
    assert out2.shape == (5, 13, in_channels * (2 * 6 + 1)), out2.shape
    assert jnp.allclose(out2, ref2, atol=1e-5, rtol=1e-5), "case 2 mismatch vs reference"

    print("KERNEL_OK")
</pallas_src>

<mosaic_0001>
module attributes {stable_mosaic.version = 11 : i64} {
  func.func @_pos_emb_kernel(%arg0: i32, %arg1: memref<16x8xf32, #tpu.memory_space<vmem>>, %arg2: memref<1x80xf32, #tpu.memory_space<vmem>>, %arg3: memref<16x168xf32, #tpu.memory_space<vmem>>) attributes {dimension_semantics = [#tpu.dimension_semantics<parallel>], iteration_bounds = array<i64: 4>, scalar_prefetch = 0 : i64, scratch_operands = 0 : i64, tpu.core_type = #tpu.core_type<tc>, window_params = [{transform_indices = @transform_0, window_bounds = array<i64: 16, 8>}, {pipeline_mode = #tpu.pipeline_mode<synchronous>, transform_indices = @transform_1, window_bounds = array<i64: 1, 80>}, {transform_indices = @transform_2, window_bounds = array<i64: 16, 168>}]} {
    %c0 = arith.constant 0 : index
    %c0_0 = arith.constant 0 : index
    %0 = vector.load %arg1[%c0, %c0_0] : memref<16x8xf32, #tpu.memory_space<vmem>>, vector<16x8xf32>
    %1 = tpu.concatenate %0, %0 in 1 : vector<16x8xf32>, vector<16x8xf32> -> vector<16x16xf32>
    %2 = tpu.concatenate %1, %1 in 1 : vector<16x16xf32>, vector<16x16xf32> -> vector<16x32xf32>
    %3 = tpu.concatenate %2, %2 in 1 : vector<16x32xf32>, vector<16x32xf32> -> vector<16x64xf32>
    %4 = tpu.concatenate %1, %3 in 1 : vector<16x16xf32>, vector<16x64xf32> -> vector<16x80xf32>
    %c0_1 = arith.constant 0 : index
    %c0_2 = arith.constant 0 : index
    %5 = vector.load %arg2[%c0_1, %c0_2] : memref<1x80xf32, #tpu.memory_space<vmem>>, vector<1x80xf32>
    %6 = vector.broadcast %5 : vector<1x80xf32> to vector<16x80xf32>
    %7 = arith.mulf %4, %6 : vector<16x80xf32>
    %8 = math.sin %7 : vector<16x80xf32>
    %9 = math.cos %7 : vector<16x80xf32>
    %10 = vector.extract_strided_slice %8 {offsets = [0, 0], sizes = [16, 8], strides = [1, 1]} : vector<16x80xf32> to vector<16x8xf32>
    %11 = vector.extract_strided_slice %9 {offsets = [0, 0], sizes = [16, 8], strides = [1, 1]} : vector<16x80xf32> to vector<16x8xf32>
    %12 = vector.extract_strided_slice %8 {offsets = [0, 8], sizes = [16, 8], strides = [1, 1]} : vector<16x80xf32> to vector<16x8xf32>
    %13 = vector.extract_strided_slice %9 {offsets = [0, 8], sizes = [16, 8], strides = [1, 1]} : vector<16x80xf32> to vector<16x8xf32>
    %14 = vector.extract_strided_slice %8 {offsets = [0, 16], sizes = [16, 8], strides = [1, 1]} : vector<16x80xf32> to vector<16x8xf32>
    %15 = vector.extract_strided_slice %9 {offsets = [0, 16], sizes = [16, 8], strides = [1, 1]} : vector<16x80xf32> to vector<16x8xf32>
    %16 = vector.extract_strided_slice %8 {offsets = [0, 24], sizes = [16, 8], strides = [1, 1]} : vector<16x80xf32> to vector<16x8xf32>
    %17 = vector.extract_strided_slice %9 {offsets = [0, 24], sizes = [16, 8], strides = [1, 1]} : vector<16x80xf32> to vector<16x8xf32>
    %18 = vector.extract_strided_slice %8 {offsets = [0, 32], sizes = [16, 8], strides = [1, 1]} : vector<16x80xf32> to vector<16x8xf32>
    %19 = vector.extract_strided_slice %9 {offsets = [0, 32], sizes = [16, 8], strides = [1, 1]} : vector<16x80xf32> to vector<16x8xf32>
    %20 = vector.extract_strided_slice %8 {offsets = [0, 40], sizes = [16, 8], strides = [1, 1]} : vector<16x80xf32> to vector<16x8xf32>
    %21 = vector.extract_strided_slice %9 {offsets = [0, 40], sizes = [16, 8], strides = [1, 1]} : vector<16x80xf32> to vector<16x8xf32>
    %22 = vector.extract_strided_slice %8 {offsets = [0, 48], sizes = [16, 8], strides = [1, 1]} : vector<16x80xf32> to vector<16x8xf32>
    %23 = vector.extract_strided_slice %9 {offsets = [0, 48], sizes = [16, 8], strides = [1, 1]} : vector<16x80xf32> to vector<16x8xf32>
    %24 = vector.extract_strided_slice %8 {offsets = [0, 56], sizes = [16, 8], strides = [1, 1]} : vector<16x80xf32> to vector<16x8xf32>
    %25 = vector.extract_strided_slice %9 {offsets = [0, 56], sizes = [16, 8], strides = [1, 1]} : vector<16x80xf32> to vector<16x8xf32>
    %26 = vector.extract_strided_slice %8 {offsets = [0, 64], sizes = [16, 8], strides = [1, 1]} : vector<16x80xf32> to vector<16x8xf32>
    %27 = vector.extract_strided_slice %9 {offsets = [0, 64], sizes = [16, 8], strides = [1, 1]} : vector<16x80xf32> to vector<16x8xf32>
    %28 = vector.extract_strided_slice %8 {offsets = [0, 72], sizes = [16, 8], strides = [1, 1]} : vector<16x80xf32> to vector<16x8xf32>
    %29 = vector.extract_strided_slice %9 {offsets = [0, 72], sizes = [16, 8], strides = [1, 1]} : vector<16x80xf32> to vector<16x8xf32>
    %30 = tpu.concatenate %0, %10, %11, %12, %13, %14, %15, %16, %17, %18, %19, %20, %21, %22, %23, %24 in 1 : vector<16x8xf32>, vector<16x8xf32>, vector<16x8xf32>, vector<16x8xf32>, vector<16x8xf32>, vector<16x8xf32>, vector<16x8xf32>, vector<16x8xf32>, vector<16x8xf32>, vector<16x8xf32>, vector<16x8xf32>, vector<16x8xf32>, vector<16x8xf32>, vector<16x8xf32>, vector<16x8xf32>, vector<16x8xf32> -> vector<16x128xf32>
    %31 = tpu.concatenate %25, %26, %27, %28, %29 in 1 : vector<16x8xf32>, vector<16x8xf32>, vector<16x8xf32>, vector<16x8xf32>, vector<16x8xf32> -> vector<16x40xf32>
    %32 = tpu.concatenate %30, %31 in 1 : vector<16x128xf32>, vector<16x40xf32> -> vector<16x168xf32>
    %c0_3 = arith.constant 0 : index
    %c0_4 = arith.constant 0 : index
    %33 = vector.load %arg3[%c0_3, %c0_4] : memref<16x168xf32, #tpu.memory_space<vmem>>, vector<16x168xf32>
    tpu.vector_store %arg3[%c0_3, %c0_4], %32 {strides = array<i32>} : memref<16x168xf32, #tpu.memory_space<vmem>>, vector<16x168xf32>,
    return
  }
  func.func @transform_0(%arg0: i32) -> (i32, i32) {
    %c0_i32 = arith.constant 0 : i32
    %c0_i32_0 = arith.constant 0 : i32
    return %arg0, %c0_i32 : i32, i32
  }
  func.func @transform_1(%arg0: i32) -> (i32, i32) {
    %c0_i32 = arith.constant 0 : i32
    %c0_i32_0 = arith.constant 0 : i32
    %c0_i32_1 = arith.constant 0 : i32
    return %c0_i32, %c0_i32_0 : i32, i32
  }
  func.func @transform_2(%arg0: i32) -> (i32, i32) {
    %c0_i32 = arith.constant 0 : i32
    %c0_i32_0 = arith.constant 0 : i32
    return %arg0, %c0_i32 : i32, i32
  }
}

</mosaic_0001>

<bundles_post_ra>
// kernel: tpu_custom_call.1
= control target key start
LH: loop header
LB: loop body
LE: loop exit
PB: predicated region body
PF: predicated region fallthrough
CT: control target
= control target key end

     0   :  { %7 = vsyncpa [#allocation3], 0  ;;  %s1351_s0 = inlined_call_operand.vmem [shape: f32[64,8], index: 0, kind: input, shape index: {}]   ;;  %s1352_s1 = inlined_call_operand.vmem [shape: f32[1,80], index: 1, kind: input, shape index: {}]   ;;  %s1353_s2 = inlined_call_operand.hbm [shape: f32[64,168], index: 2, kind: output, shape index: {}]  }
   0x1   :  { %9 = vsyncpa [#allocation3 + $0x1], 0  ;;  %s1071_s9 = smov 0   ;;  %s1073_s10 = smov 0  }
   0x2   :  { %s1075_s11 = smov 0   ;;  %s1077_s12 = smov 0  }
   0x3 LB: > { %s1092_s13 = sadd.s32 4294967295, %s1035_s12   ;;  %s868_s14 = sadd.s32 4294967294, %s1035_s12   ;;  %s1035_s12 = sphi %s1077_s12, %s1359_s12   ;;  %s1031_s11 = sphi %s1075_s11, %s1358_s11   ;;  %s1027_s10 = sphi %s1073_s10, %s1357_s10   ;;  %s1023_s9 = sphi %s1071_s9, %s1356_s9  }
   0x4   : > { %s1096_s15 = sadd.s32 1, %s1035_s12   ;;  %s69_s16 = sadd.s32 1, %s1031_s11 }
   0x5   : > { %s66_s17 = ssub.s32 %s1035_s12, %s1096_s15  ;;  %p79_p0 = scmp.ne.s32.totalorder %s1031_s11, %s1027_s10 }
   0x6   : > { %p67_p1 = scmp.eq.s32.totalorder %s66_s17, 0  ;;  %p80_p2 = scmp.eq.s32.totalorder %s1092_s13, 3 }
   0x7   : > { %p85_p3 = scmp.ne.s32.totalorder %s1027_s10, %s1023_s9  ;;  %p86_p4 = scmp.eq.s32.totalorder %s868_s14, 3 }
   0x8   : > { %s1107_s18 = scalar_select %p67_p1, %s1031_s11, %s69_s16  }
   0x9   : > { %p1109_p5 = por %p80_p2, %p79_p0  ;;  %p1113_p6 = por %p86_p4, %p85_p3 }
   0xa   : > { %p871_p7 = scmp.ge.s32.totalorder %s1035_s12, 1  ;;  %p116_p8 = scmp.lt.s32.totalorder %s1035_s12, 5 }
   0xc   : > { %p117_p9 = pnand %p871_p7, %p116_p8 }
   0xd   : > { %s873_s21 = sshll.u32 (!%p117_p9), %s1092_s13, 1  ;;  %s1037_s26 = smov (!%p117_p9), 8   ;;  %vm155_vm0 = vcmask (!%p117_p9), 64512   ;;  %vm166_vm1 = vcmask (!%p117_p9), 130048   ;;  %vm177_vm2 = vcmask (!%p117_p9), 261120  }
   0xe   : > { %120 = sbr.rel (%p117_p9) target bundleno = 788 (0x314), region = 28  ;;  %p139_p10 = scmp.lt.s32.totalorder (!%p117_p9), %s873_s21, 7  ;;  %v875_v14 = vld [vmem:[%s1352_s1] ss:$0 sm:$0xff] (!%p117_p9)  ;;  %v1040_v37 = vmov (!%p117_p9), 683565275  }
   0xf   : > { %s1038_s27 = smov (!%p117_p9), 16   ;;  %s1039_s28 = smov (!%p117_p9), 32   ;;  %v1041_v41 = vmov (!%p117_p9), 2475754826   ;;  %v1042_v43 = vmov (!%p117_p9), 2131351028  }
  0x10   : > { %v1043_v45 = vmov (!%p117_p9), 2102212464   ;;  %v1044_v47 = vmov (!%p117_p9), 920167782   ;;  %v1045_v54 = vmov (!%p117_p9), 1326507024  }
  0x11   : > { %s1046_s3 = smov (!%p117_p9), 24   ;;  %s1047_s4 = smov (!%p117_p9), 40  }
  0x12   : > { %s1048_s5 = smov (!%p117_p9), 48   ;;  %s1049_s6 = smov (!%p117_p9), 56  }
  0x13   : > { %s1050_s7 = smov (!%p117_p9), 72   ;;  %s1051_s8 = smov (!%p117_p9), 80  }
  0x14   : > { %s1052_s14 = smov (!%p117_p9), 64   ;;  %s1053_s16 = smov (!%p117_p9), 88  }
  0x15   : > { %s1361_s21 = smov (!%p139_p10, %s873_s21), 7  ;;  %s135_s17 = sand.u32 1, %s1027_s10  }
  0x16   : > { %s874_s22 = sshll.u32 %s1361_s21, 3  ;;  %s872_s21 = sshll.u32 %s135_s17, 5 }
  0x17   : > { %s142_s25 = scalar_lea.vmem %s1351_s0, %s874_s22  ;;  %s1272_s22 = scalar_lea.vmem [#allocation2], %s872_s21 }
  0x18   : > { %v1123_v0 = vld [vmem:[%s142_s25] sm:$0xff]  ;;  %v1127_v1 = vld [vmem:[%s142_s25 + $0x8] sm:$0xff]  ;;  %s806_s23 = sshll.u32 %s1272_s22, 4  ;;  %s899_s24 = sshll.u32 %s1092_s13, 9  ;;  %s1296_s23 = int_to_ptr.vmem [resolvable:$true] %s806_s23 }
  0x19   : > { %149 = vrot.lane.b32.xlu0 %v1123_v0, %s1037_s26  ;;  %s1309_s13 = scalar_lea.sflag [#allocation3], %s135_s17  ;;  %s973_s29 = scalar_lea.vmem %s1296_s23, 512 }
  0x1a   : > { %p974_p11 = scmp.ne.s32.totalorder %s1296_s23, %s973_s29  ;;  %s1054_s30 = smov [#allocation2]  }
  0x1c   : > { %p975_p12 = pnand %p974_p11, %p1109_p5 }
  0x1d   : > { %151 = vrot.lane.b32.xlu0 %v1127_v1, %s1037_s26 }
  0x1e   : > { %p976_p13 = pneg %p975_p12 }
  0x8b   : > { %v150_v2 = vpop.permute.xlu0 %149 }
  0x8c   : > { %v156_v3 = vsel %vm155_vm0, %v1123_v0, %v150_v2 }
  0x8d   : > { %160 = vrot.lane.b32.xlu1 %v156_v3, %s1038_s27 }
  0x8f   : > { %v152_v4 = vpop.permute.xlu0 %151 }
  0x90   : > { %v157_v5 = vsel %vm155_vm0, %v1127_v1, %v152_v4 }
  0x91   : > { %162 = vrot.lane.b32.xlu1 %v157_v5, %s1038_s27 }
  0xff   : > { %v161_v6 = vpop.permute.xlu1 %160 }
 0x100   : > { %v167_v7 = vsel %vm166_vm1, %v156_v3, %v161_v6 }
 0x101   : > { %171 = vrot.lane.b32.xlu0 %v167_v7, %s1039_s28 }
 0x103   : > { %v163_v8 = vpop.permute.xlu1 %162 }
 0x104   : > { %v168_v9 = vsel %vm166_vm1, %v157_v5, %v163_v8 }
 0x105   : > { %173 = vrot.lane.b32.xlu1 %v168_v9, %s1039_s28 }
 0x173   : > { %v172_v10 = vpop.permute.xlu0 %171 }
 0x174   : > { %v178_v11 = vsel %vm177_vm2, %v167_v7, %v172_v10 }
 0x175   : > { %182 = vrot.lane.b32.xlu0 %v178_v11, %s1038_s27 }
 0x177   : > { %v174_v12 = vpop.permute.xlu1 %173 }
 0x178   : > { %v179_v13 = vsel %vm177_vm2, %v168_v9, %v174_v12 }
 0x179   : > { %184 = vrot.lane.b32.xlu1 %v179_v13, %s1038_s27 }
 0x1e7   : > { %v183_v15 = vpop.permute.xlu0 %182 }
 0x1e8   : > { %v188_v16 = vsel %vm166_vm1, %v156_v3, %v183_v15 }
 0x1e9   : > { %v1149_v17 = vmul.f32 %v875_v14, %v188_v16 }
 0x1eb   : > { %v199_v18 = vand.u32 2147483647, %v1149_v17  ;;  %v202_v19 = vand.u32 2139095040, %v1149_v17  ;;  %v185_v20 = vpop.permute.xlu1 %184 }
 0x1ec   : > { %v189_v21 = vsel %vm166_vm1, %v157_v5, %v185_v20 }
 0x1ed   : > { %v203_v22 = vshrl.u32 %v202_v19, 23  ;;  %v1154_v23 = vmul.f32 %v875_v14, %v189_v21  ;;  %v206_v24 = vand.u32 8388607, %v199_v18 }
 0x1ef   : > { %v876_v25 = vadd.s32 4294967169, %v203_v22  ;;  %v306_v26 = vand.u32 2139095040, %v1154_v23  ;;  %v207_v28 = vor.u32 8388608, %v206_v24  ;;  %v303_v30 = vand.u32 2147483647, %v1154_v23 }
 0x1f1   : > { %v209_v27 = vadd.s32 1, %v876_v25  ;;  %v307_v29 = vshrl.u32 %v306_v26, 23  ;;  %v1160_v35 = vshll.u32 %v207_v28, 8  ;;  %v310_v39 = vand.u32 8388607, %v303_v30 }
 0x1f3   : > { %vm210_vm3 = vcmp.gt.s32.totalorder %v209_v27, 0  ;;  %v880_v32 = vadd.s32 4294967169, %v307_v29  ;;  %v311_v7 = vor.u32 8388608, %v310_v39 }
 0x1f4   : > { %v211_v31 = vsel %vm210_vm3, %v209_v27, 0 }
 0x1f5   : > { %v212_v33 = vshrl.u32 %v211_v31, 5  ;;  %v213_v34 = vand.u32 31, %v211_v31  ;;  %v313_v40 = vadd.s32 1, %v880_v32  ;;  %v351_v22 = vshll.u32 %v311_v7, 8 }
 0x1f7   : > { %v214_v36 = vsub.s32 32, %v213_v34  ;;  %v216_v38 = vshll.u32 %v1040_v37, %v213_v34  ;;  %v219_v42 = vshll.u32 %v1041_v41, %v213_v34  ;;  %v222_v44 = vshll.u32 %v1042_v43, %v213_v34 }
 0x1f8   : > { %v225_v46 = vshll.u32 %v1043_v45, %v213_v34  ;;  %v228_v48 = vshll.u32 %v1044_v47, %v213_v34  ;;  %vm231_vm4 = vcmp.lt.s32.totalorder %v212_v33, 1  ;;  %vm233_vm5 = vcmp.lt.s32.totalorder %v212_v33, 3 }
 0x1f9   : > { %v217_v49 = vshrl.u32 %v1041_v41, %v214_v36  ;;  %v220_v50 = vshrl.u32 %v1042_v43, %v214_v36  ;;  %v223_v51 = vshrl.u32 %v1043_v45, %v214_v36  ;;  %v215_v52 = vshrl.u32 %v1040_v37, %v214_v36 }
 0x1fa   : > { %v226_v53 = vshrl.u32 %v1044_v47, %v214_v36  ;;  %v229_v55 = vshrl.u32 %v1045_v54, %v214_v36  ;;  %vm314_vm6 = vcmp.gt.s32.totalorder %v313_v40, 0  ;;  %vm234_vm7 = vcmp.lt.s32.totalorder %v212_v33, 4 }
 0x1fb   : > { %v218_v56 = vor.u32 %v217_v49, %v216_v38  ;;  %v221_v57 = vor.u32 %v220_v50, %v219_v42  ;;  %v224_v58 = vor.u32 %v223_v51, %v222_v44  ;;  %v315_v61 = vsel %vm314_vm6, %v313_v40, 0 }
 0x1fc   : > { %v227_v59 = vor.u32 %v226_v53, %v225_v46  ;;  %v230_v60 = vor.u32 %v229_v55, %v228_v48  ;;  %vm232_vm8 = vcmp.lt.s32.totalorder %v212_v33, 2  ;;  %v317_v10 = vand.u32 31, %v315_v61 }
 0x1fd   : > { %v235_v62 = vsel %vm231_vm4, %v215_v52, %v218_v56  ;;  %v236_v63 = vsel %vm234_vm7, %v224_v58, 2102212464  ;;  %v239_v2 = vsel %vm231_vm4, %v218_v56, %v221_v57  ;;  %v243_v3 = vsel %vm231_vm4, %v221_v57, %v224_v58 }
 0x1fe   : > { %v237_v4 = vsel %vm233_vm5, %v221_v57, %v236_v63  ;;  %v240_v5 = vsel %vm234_vm7, %v227_v59, 920167782  ;;  %v244_v6 = vsel %vm234_vm7, %v230_v60, 1326507024  ;;  %v316_v20 = vshrl.u32 %v315_v61, 5 }
 0x1ff   : > { %v241_v8 = vsel %vm233_vm5, %v224_v58, %v240_v5  ;;  %v245_v9 = vsel %vm233_vm5, %v227_v59, %v244_v6  ;;  %v238_v11 = vsel %vm232_vm8, %v235_v62, %v237_v4  ;;  %v318_v21 = vsub.s32 32, %v317_v10 }
 0x200   : > { %v242_v12 = vsel %vm232_vm8, %v239_v2, %v241_v8  ;;  %v246_v13 = vsel %vm232_vm8, %v243_v3, %v245_v9  ;;  %v254_v24 = vmul.u32 %v1160_v35, %v238_v11  ;;  %v320_v25 = vshll.u32 %v1040_v37, %v317_v10 }
 0x201   : > { %v1173_v14 = vmul.u32.u64.low %v1160_v35, %v246_v13  ;;  %v1174_v15 = vmul.u32.u64.high %v1160_v35, %v246_v13, %v1173_v14  ;;  %v1177_v16 = vmul.u32.u64.low %v1160_v35, %v242_v12  ;;  %v1178_v19 = vmul.u32.u64.high %v1160_v35, %v242_v12, %v1177_v16 }
 0x202   : > { %v323_v26 = vshll.u32 %v1041_v41, %v317_v10  ;;  %v326_v27 = vshll.u32 %v1042_v43, %v317_v10  ;;  %v321_v28 = vshrl.u32 %v1041_v41, %v318_v21  ;;  %v324_v29 = vshrl.u32 %v1042_v43, %v318_v21 }
 0x203   : > { %v327_v31 = vshrl.u32 %v1043_v45, %v318_v21  ;;  %v329_v32 = vshll.u32 %v1043_v45, %v317_v10  ;;  %vm256_vm9 = vc.u32 %v1174_v15, %v1177_v16  ;;  %v257_v33 = vadd.s32 1, %v1178_v19 }
 0x204   : > { %v330_v34 = vshrl.u32 %v1044_v47, %v318_v21  ;;  %v332_v36 = vshll.u32 %v1044_v47, %v317_v10  ;;  %v322_v38 = vor.u32 %v321_v28, %v320_v25  ;;  %v325_v39 = vor.u32 %v324_v29, %v323_v26 }
 0x205   : > { %v328_v40 = vor.u32 %v327_v31, %v326_v27  ;;  %v333_v42 = vshrl.u32 %v1045_v54, %v318_v21  ;;  %v258_v35 = vsel %vm256_vm9, %v257_v33, %v1178_v19  ;;  %vm335_vm10 = vcmp.lt.s32.totalorder %v316_v20, 1 }
 0x206   : > { %v331_v44 = vor.u32 %v330_v34, %v329_v32  ;;  %vm338_vm11 = vcmp.lt.s32.totalorder %v316_v20, 4  ;;  %v259_v41 = vadd.s32 %v258_v35, %v254_v24  ;;  %vm337_vm12 = vcmp.lt.s32.totalorder %v316_v20, 3 }
 0x207   : > { %v334_v43 = vor.u32 %v333_v42, %v332_v36  ;;  %v340_v45 = vsel %vm338_vm11, %v328_v40, 2102212464  ;;  %v319_v46 = vshrl.u32 %v1040_v37, %v318_v21  ;;  %v343_v48 = vsel %vm335_vm10, %v322_v38, %v325_v39 }
 0x208   : > { %v344_v49 = vsel %vm338_vm11, %v331_v44, 920167782  ;;  %v347_v50 = vsel %vm335_vm10, %v325_v39, %v328_v40  ;;  %v260_v51 = vadd.s32 536870912, %v259_v41  ;;  %vm336_vm13 = vcmp.lt.s32.totalorder %v316_v20, 2 }
 0x209   : > { %v345_v47 = vsel %vm337_vm12, %v328_v40, %v344_v49  ;;  %v348_v52 = vsel %vm338_vm11, %v334_v43, 1326507024  ;;  %v339_v53 = vsel %vm335_vm10, %v319_v46, %v322_v38  ;;  %v341_v54 = vsel %vm337_vm12, %v325_v39, %v340_v45 }
 0x20a   : > { %v346_v55 = vsel %vm336_vm13, %v343_v48, %v345_v47  ;;  %v349_v56 = vsel %vm337_vm12, %v331_v44, %v348_v52  ;;  %v261_v57 = vshrl.u32 %v260_v51, 30  ;;  %v342_v63 = vsel %vm336_vm13, %v339_v53, %v341_v54 }
 0x20b   : > { %v350_v58 = vsel %vm336_vm13, %v347_v50, %v349_v56  ;;  %v1188_v59 = vmul.u32.u64.low %v351_v22, %v346_v55  ;;  %v1189_v60 = vmul.u32.u64.high %v351_v22, %v346_v55, %v1188_v59  ;;  %v358_v4 = vmul.u32 %v351_v22, %v342_v63 }
 0x20c   : > { %v1191_v61 = vmul.u32.u64.low %v351_v22, %v350_v58  ;;  %v1192_v62 = vmul.u32.u64.high %v351_v22, %v350_v58, %v1191_v61  ;;  %v262_v37 = vshll.u32 %v261_v57, 30  ;;  %v255_v20 = vadd.s32 %v1177_v16, %v1174_v15 }
 0x20d   : > { %v361_v3 = vadd.s32 1, %v1189_v60  ;;  %v285_v40 = vsub.s32 4, %v261_v57  ;;  %vm201_vm4 = vcmp.lt.s32.totalorder %v1149_v17, 0  ;;  %vm200_vm5 = vcmp.le.f32.partialorder %v199_v18, 0.7853982 }
 0x20e   : > { %v263_v2 = vsub.s32 %v259_v41, %v262_v37  ;;  %vm360_vm14 = vc.u32 %v1192_v62, %v1188_v59  ;;  %v359_v15 = vadd.s32 %v1188_v59, %v1192_v62  ;;  %vm305_vm6 = vcmp.lt.s32.totalorder %v1154_v23, 0 }
 0x20f   : > { %v362_v6 = vsel %vm360_vm14, %v361_v3, %v1189_v60  ;;  %v286_v48 = vsel %vm201_vm4, %v285_v40, %v261_v57  ;;  %vm304_vm7 = vcmp.le.f32.partialorder %v303_v30, 0.7853982  ;;  %vm291_vm13 = vweird.f32 %v1149_v17 }
 0x210   : > { %v265_v5 = vsub.s32 0, %v263_v2  ;;  %v363_v7 = vadd.s32 %v362_v6, %v358_v4  ;;  %v288_v47 = vsel %vm200_vm5, 0, %v286_v48 }
 0x211   : > { %v292_v55 = vadd.s32 3, %v288_v47  ;;  %v500_v18 = vand.u32 3, %v288_v47 }
 0x212   : > { %v877_v8 = vmin.u32 %v265_v5, %v263_v2  ;;  %v364_v9 = vadd.s32 536870912, %v363_v7 }
 0x213   : > { %v293_v60 = vand.u32 3, %v292_v55  ;;  %vm502_vm10 = vcmp.eq.s32.totalorder %v500_v18, 0  ;;  %vm505_vm11 = vcmp.eq.s32.totalorder %v500_v18, 2  ;;  %vm501_vm14 = vcmp.lt.s32.totalorder %v500_v18, 2 }
 0x214   : > { %v267_v10 = vclz %v877_v8  ;;  %v365_v11 = vshrl.u32 %v364_v9, 30 }
 0x215   : > { %vm298_vm8 = vcmp.eq.s32.totalorder %v293_v60, 2  ;;  %vm295_vm9 = vcmp.eq.s32.totalorder %v293_v60, 0  ;;  %vm294_vm12 = vcmp.lt.s32.totalorder %v293_v60, 2 }
 0x216   : > { %v878_v12 = vadd.s32 4294967294, %v267_v10  ;;  %v366_v13 = vshll.u32 %v365_v11, 30  ;;  %v389_v58 = vsub.s32 4, %v365_v11 }
 0x218   : > { %vm879_vm15 = vcmp.lt.s32.totalorder %v878_v12, 0  ;;  %v367_v19 = vsub.s32 %v363_v7, %v366_v13  ;;  %v390_v61 = vsel %vm305_vm6, %v389_v58, %v365_v11 }
 0x219   : > { %v270_v14 = vsel %vm879_vm15, 0, %v878_v12  ;;  %v392_v4 = vsel %vm304_vm7, 0, %v390_v61 }
 0x21a   : > { %v271_v21 = vsub.s32 32, %v270_v14  ;;  %v275_v22 = vsub.s32 4294967266, %v270_v14  ;;  %v369_v24 = vsub.s32 0, %v367_v19  ;;  %v272_v25 = vshll.u32 %v263_v2, %v270_v14 }
 0x21b   : > { %v396_v9 = vadd.s32 3, %v392_v4  ;;  %v603_v14 = vand.u32 3, %v392_v4 }
 0x21c   : > { %v273_v26 = vshrl.u32 %v255_v20, %v271_v21  ;;  %v276_v27 = vadd.s32 127, %v275_v22  ;;  %v881_v28 = vmin.u32 %v369_v24, %v367_v19 }
 0x21d   : > { %v397_v12 = vand.u32 3, %v396_v9 }
 0x21e   : > { %v274_v29 = vor.u32 %v273_v26, %v272_v25  ;;  %v277_v31 = vshll.u32 %v276_v27, 23  ;;  %v371_v32 = vclz %v881_v28 }
 0x21f   : > { %vm402_vm15 = vcmp.eq.s32.totalorder %v397_v12, 2 }
 0x220   : > { %v278_v33 = vor.u32 4788187, %v277_v31  ;;  %v882_v34 = vadd.s32 4294967294, %v371_v32  ;;  %v281_v38 = vcvt.s32.f32 %v274_v29 }
 0x222   : > { %v279_v36 = vand.u32 2147483647, %v278_v33  ;;  %vm883_vm3 = vcmp.lt.s32.totalorder %v882_v34, 0 }
 0x223   : > { %v374_v42 = vsel %vm883_vm3, 0, %v882_v34  ;;  %vm399_vm3 = vcmp.eq.s32.totalorder %v397_v12, 0 }
 0x224   : > { %v282_v39 = vmul.f32 %v281_v38, %v279_v36  ;;  %v375_v16 = vsub.s32 32, %v374_v42  ;;  %v379_v35 = vsub.s32 4294967266, %v374_v42  ;;  %v376_v41 = vshll.u32 %v367_v19, %v374_v42 }
 0x226   : > { %v283_v44 = vxor.u32 2147483648, %v282_v39  ;;  %v377_v43 = vshrl.u32 %v359_v15, %v375_v16  ;;  %v380_v45 = vadd.s32 127, %v379_v35 }
 0x228   : > { %v284_v46 = vsel %vm201_vm4, %v283_v44, %v282_v39  ;;  %v378_v50 = vor.u32 %v377_v43, %v376_v41  ;;  %v381_v51 = vshll.u32 %v380_v45, 23  ;;  %vm605_vm4 = vcmp.eq.s32.totalorder %v603_v14, 0 }
 0x229   : > { %v287_v49 = vsel %vm200_vm5, %v1149_v17, %v284_v46  ;;  %vm608_vm5 = vcmp.eq.s32.totalorder %v603_v14, 2 }
 0x22a   : > { %965 = vcosq.f32 %v287_v49  ;;  %v382_v52 = vor.u32 4788187, %v381_v51  ;;  %v385_v54 = vcvt.s32.f32 %v378_v50 }
 0x22b   : > { %967 = vsinq.f32 %v287_v49 }
 0x22c   : > { %v383_v53 = vand.u32 2147483647, %v382_v52 }
 0x22e   : > { %v386_v56 = vmul.f32 %v385_v54, %v383_v53 }
 0x230   : > { %v387_v59 = vxor.u32 2147483648, %v386_v56 }
 0x232   : > { %v388_v57 = vsel %vm305_vm6, %v387_v59, %v386_v56  ;;  %vm398_vm6 = vcmp.lt.s32.totalorder %v397_v12, 2 }
 0x233   : > { %v391_v37 = vsel %vm304_vm7, %v1154_v23, %v388_v57  ;;  %vm395_vm7 = vweird.f32 %v1154_v23 }
 0x234   : > { %v966_v62 = vpop.eup %965  ;;  %969 = vcosq.f32 %v391_v37 }
 0x235   : > { %v968_v63 = vpop.eup %967  ;;  %v299_v2 = vxor.u32 2147483648, %v966_v62  ;;  %971 = vsinq.f32 %v391_v37 }
 0x236   : > { %v296_v3 = vxor.u32 2147483648, %v968_v63 }
 0x237   : > { %v300_v5 = vsel %vm298_vm8, %v299_v2, %v968_v63  ;;  %v507_v30 = vsel %vm505_vm11, %v299_v2, %v968_v63  ;;  %vm604_vm8 = vcmp.lt.s32.totalorder %v603_v14, 2  ;;  %vm719_vm11 = vcmask 392192  }
 0x238   : > { %v297_v6 = vsel %vm295_vm9, %v966_v62, %v296_v3  ;;  %v504_v7 = vsel %vm502_vm10, %v966_v62, %v296_v3  ;;  %vm711_vm9 = vcmask 195584   ;;  %vm716_vm10 = vcmask 326656  }
 0x239   : > { %v301_v8 = vsel %vm294_vm12, %v297_v6, %v300_v5  ;;  %v508_v11 = vsel %vm501_vm14, %v504_v7, %v507_v30  ;;  %vm722_vm12 = vcmask 457728   ;;  %vm728_vm14 = vcmask 588800  }
 0x23a   : > { %v1209_v10 = vsel %vm291_vm13, nan, %v301_v8  ;;  %v1213_v13 = vsel %vm291_vm13, nan, %v508_v11  ;;  %vm725_vm13 = vcmask 523264  }
 0x23b   : > { %615 = vrot.lane.b32.xlu0 %v1209_v10, %s1037_s26 }
 0x23e   : > { %v970_v19 = vpop.eup %969 }
 0x23f   : > { %623 = vrot.lane.b32.xlu0 %v1213_v13, %s1038_s27  ;;  %v972_v20 = vpop.eup %971  ;;  %v403_v21 = vxor.u32 2147483648, %v970_v19 }
 0x240   : > { %v400_v17 = vxor.u32 2147483648, %v972_v20 }
 0x241   : > { %v404_v22 = vsel %vm402_vm15, %v403_v21, %v972_v20  ;;  %v610_v26 = vsel %vm608_vm5, %v403_v21, %v972_v20  ;;  %vm731_vm15 = vcmask 654336   ;;  %vm740_vm5 = vcmask 850944  }
 0x242   : > { %v401_v24 = vsel %vm399_vm3, %v970_v19, %v400_v17  ;;  %v607_v25 = vsel %vm605_vm4, %v970_v19, %v400_v17  ;;  %vm734_vm3 = vcmask 719872   ;;  %vm737_vm4 = vcmask 785408  }
 0x243   : > { %629 = vrot.lane.b32.xlu0 %v1209_v10, %s1038_s27  ;;  %v405_v27 = vsel %vm398_vm6, %v401_v24, %v404_v22  ;;  %v611_v29 = vsel %vm604_vm8, %v607_v25, %v610_v26  ;;  %vm743_vm6 = vcmask 916480  }
 0x244   : > { %v406_v28 = vsel %vm395_vm7, nan, %v405_v27  ;;  %v612_v31 = vsel %vm395_vm7, nan, %v611_v29  ;;  %vm746_vm7 = vcmask 982016  }
 0x245   : > { %617 = vrot.lane.b32.xlu1 %v406_v28, %s1037_s26 }
 0x247   : > { %635 = vrot.lane.b32.xlu0 %v1213_v13, %s1046_s3 }
 0x249   : > { %625 = vrot.lane.b32.xlu1 %v612_v31, %s1038_s27 }
 0x24b   : > { %641 = vrot.lane.b32.xlu0 %v1209_v10, %s1046_s3 }
 0x24d   : > { %631 = vrot.lane.b32.xlu1 %v406_v28, %s1038_s27 }
 0x24f   : > { %647 = vrot.lane.b32.xlu0 %v1213_v13, %s1039_s28 }
 0x251   : > { %637 = vrot.lane.b32.xlu1 %v612_v31, %s1046_s3 }
 0x253   : > { %653 = vrot.lane.b32.xlu0 %v1209_v10, %s1039_s28 }
 0x255   : > { %643 = vrot.lane.b32.xlu1 %v406_v28, %s1046_s3  ;;  %s977_s3 = sshll.u32 %s1054_s30, 4  ;;  %s978_s3 = int_to_ptr.vmem [resolvable:$false] %s977_s3 }
 0x256   : > { %p980_p0 = scmp.lt.s32.totalorder %s1296_s23, %s978_s3 }
 0x257   : > { %659 = vrot.lane.b32.xlu0 %v1213_v13, %s1047_s4 }
 0x259   : > { %649 = vrot.lane.b32.xlu1 %v612_v31, %s1039_s28 }
 0x25b   : > { %665 = vrot.lane.b32.xlu0 %v1209_v10, %s1047_s4 }
 0x25d   : > { %655 = vrot.lane.b32.xlu1 %v406_v28, %s1039_s28  ;;  %s1302_s28 = scalar_lea.hbm %s1353_s2, %s899_s24 }
 0x25f   : > { %671 = vrot.lane.b32.xlu0 %v1213_v13, %s1048_s5 }
 0x261   : > { %661 = vrot.lane.b32.xlu1 %v612_v31, %s1047_s4 }
 0x263   : > { %677 = vrot.lane.b32.xlu0 %v1209_v10, %s1048_s5 }
 0x265   : > { %667 = vrot.lane.b32.xlu1 %v406_v28, %s1047_s4  ;;  %s979_s4 = scalar_lea.vmem %s978_s3, 1024 }
 0x266   : > { %p981_p1 = scmp.lt.s32.totalorder %s979_s4, %s973_s29 }
 0x267   : > { %683 = vrot.lane.b32.xlu0 %v1213_v13, %s1049_s6 }
 0x268   : > { %p982_p2 = por %p981_p1, %p980_p0 }
 0x269   : > { %673 = vrot.lane.b32.xlu1 %v612_v31, %s1048_s5 }
 0x26a   : > { %p983_p3 = pnand %p982_p2, %p976_p13 }
 0x26b   : > { %749 = vrot.lane.b32.xlu0 %v1213_v13, %s1050_s7 }
 0x26d   : > { %679 = vrot.lane.b32.xlu1 %v406_v28, %s1048_s5 }
 0x26f   : > { %755 = vrot.lane.b32.xlu0 %v1209_v10, %s1050_s7 }
 0x271   : > { %685 = vrot.lane.b32.xlu1 %v612_v31, %s1049_s6 }
 0x273   : > { %689 = vrot.lane.b32.xlu0 %v1209_v10, %s1049_s6 }
 0x275   : > { %751 = vrot.lane.b32.xlu1 %v612_v31, %s1050_s7 }
 0x277   : > { %761 = vrot.lane.b32.xlu0 %v1213_v13, %s1051_s8 }
 0x279   : > { %757 = vrot.lane.b32.xlu1 %v406_v28, %s1050_s7 }
 0x27b   : > { %695 = vrot.lane.b32.xlu0 %v1213_v13, %s1052_s14 }
 0x27d   : > { %691 = vrot.lane.b32.xlu1 %v406_v28, %s1049_s6 }
 0x27f   : > { %767 = vrot.lane.b32.xlu0 %v1209_v10, %s1051_s8 }
 0x281   : > { %763 = vrot.lane.b32.xlu1 %v612_v31, %s1051_s8 }
 0x283   : > { %701 = vrot.lane.b32.xlu0 %v1209_v10, %s1052_s14 }
 0x285   : > { %697 = vrot.lane.b32.xlu1 %v612_v31, %s1052_s14 }
 0x287   : > { %773 = vrot.lane.b32.xlu0 %v1213_v13, %s1053_s16 }
 0x289   : > { %769 = vrot.lane.b32.xlu1 %v406_v28, %s1051_s8 }
 0x28d   : > { %703 = vrot.lane.b32.xlu1 %v406_v28, %s1052_s14 }
 0x291   : > { %775 = vrot.lane.b32.xlu1 %v612_v31, %s1053_s16 }
 0x2ad   : > { %v616_v23 = vpop.permute.xlu0 %615 }
 0x2ae   : > { %v707_v58 = vsel %vm155_vm0, %v1123_v0, %v616_v23 }
 0x2b1   : > { %v624_v32 = vpop.permute.xlu0 %623 }
 0x2b2   : > { %v709_v60 = vsel %vm166_vm1, %v707_v58, %v624_v32 }
 0x2b5   : > { %v630_v33 = vpop.permute.xlu0 %629 }
 0x2b6   : > { %v712_v57 = vsel %vm711_vm9, %v709_v60, %v630_v33 }
 0x2b7   : > { %v618_v34 = vpop.permute.xlu1 %617 }
 0x2b8   : > { %v708_v8 = vsel %vm155_vm0, %v1127_v1, %v618_v34 }
 0x2b9   : > { %v636_v36 = vpop.permute.xlu0 %635 }
 0x2ba   : > { %v714_v61 = vsel %vm177_vm2, %v712_v57, %v636_v36 }
 0x2bb   : > { %v626_v38 = vpop.permute.xlu1 %625 }
 0x2bc   : > { %v710_v10 = vsel %vm166_vm1, %v708_v8, %v626_v38 }
 0x2bd   : > { %v642_v39 = vpop.permute.xlu0 %641 }
 0x2be   : > { %v717_v62 = vsel %vm716_vm10, %v714_v61, %v642_v39 }
 0x2bf   : > { %v632_v40 = vpop.permute.xlu1 %631 }
 0x2c0   : > { %v713_v13 = vsel %vm711_vm9, %v710_v10, %v632_v40 }
 0x2c1   : > { %v648_v42 = vpop.permute.xlu0 %647 }
 0x2c2   : > { %v720_v0 = vsel %vm719_vm11, %v717_v62, %v648_v42 }
 0x2c3   : > { %v638_v15 = vpop.permute.xlu1 %637 }
 0x2c4   : > { %v715_v20 = vsel %vm177_vm2, %v713_v13, %v638_v15 }
 0x2c5   : > { %v654_v16 = vpop.permute.xlu0 %653 }
 0x2c6   : > { %v723_v2 = vsel %vm722_vm12, %v720_v0, %v654_v16 }
 0x2c7   : > { %v644_v35 = vpop.permute.xlu1 %643 }
 0x2c8   : > { %v718_v17 = vsel %vm716_vm10, %v715_v20, %v644_v35 }
 0x2c9   : > { %v660_v44 = vpop.permute.xlu0 %659 }
 0x2ca   : > { %v726_v3 = vsel %vm725_vm13, %v723_v2, %v660_v44 }
 0x2cb   : > { %v650_v41 = vpop.permute.xlu1 %649 }
 0x2cc   : > { %v721_v22 = vsel %vm719_vm11, %v718_v17, %v650_v41 }
 0x2cd   : > { %v666_v43 = vpop.permute.xlu0 %665 }
 0x2ce   : > { %v729_v4 = vsel %vm728_vm14, %v726_v3, %v666_v43 }
 0x2cf   : > { %v656_v45 = vpop.permute.xlu1 %655 }
 0x2d0   : > { %v724_v26 = vsel %vm722_vm12, %v721_v22, %v656_v45 }
 0x2d1   : > { %v672_v46 = vpop.permute.xlu0 %671 }
 0x2d2   : > { %v732_v6 = vsel %vm731_vm15, %v729_v4, %v672_v46 }
 0x2d3   : > { %v662_v48 = vpop.permute.xlu1 %661 }
 0x2d4   : > { %v727_v29 = vsel %vm725_vm13, %v724_v26, %v662_v48 }
 0x2d5   : > { %v678_v49 = vpop.permute.xlu0 %677 }
 0x2d6   : > { %v735_v30 = vsel %vm734_vm3, %v732_v6, %v678_v49 }
 0x2d7   : > { %v668_v50 = vpop.permute.xlu1 %667 }
 0x2d8   : > { %v730_v23 = vsel %vm728_vm14, %v727_v29, %v668_v50 }
 0x2d9   : > { %v684_v51 = vpop.permute.xlu0 %683 }
 0x2da   : > { %v738_v9 = vsel %vm737_vm4, %v735_v30, %v684_v51 }
 0x2db   : > { %v674_v47 = vpop.permute.xlu1 %673 }
 0x2dc   : > { %v733_v32 = vsel %vm731_vm15, %v730_v23, %v674_v47 }
 0x2dd   : > { %v750_v52 = vpop.permute.xlu0 %749 }
 0x2df   : > { %v680_v53 = vpop.permute.xlu1 %679 }
 0x2e0   : > { %v736_v34 = vsel %vm734_vm3, %v733_v32, %v680_v53 }
 0x2e1   : > { %v756_v54 = vpop.permute.xlu0 %755 }
 0x2e2   : > { %v779_v1 = vsel %vm155_vm0, %v750_v52, %v756_v54 }
 0x2e3   : > { %v686_v55 = vpop.permute.xlu1 %685 }
 0x2e4   : > { %v739_v36 = vsel %vm737_vm4, %v736_v34, %v686_v55 }
 0x2e5   : > { %v690_v56 = vpop.permute.xlu0 %689 }
 0x2e6   : > { %v741_v11 = vsel %vm740_vm5, %v738_v9, %v690_v56 }
 0x2e7   : > { %v1246_v59 = vpop.permute.xlu1 %751 }
 0x2e9   : > { %v762_v18 = vpop.permute.xlu0 %761 }
 0x2ea   : > { %v781_v24 = vsel %vm166_vm1, %v779_v1, %v762_v18 }
 0x2eb   : > { %v758_v37 = vpop.permute.xlu1 %757 }
 0x2ec   : > { %v780_v15 = vsel %vm155_vm0, %v1246_v59, %v758_v37 }
 0x2ed   : > { %v696_v63 = vpop.permute.xlu0 %695 }
 0x2ee   : > { %v744_v14 = vsel %vm743_vm6, %v741_v11, %v696_v63 }
 0x2ef   : > { %v692_v5 = vpop.permute.xlu1 %691 }
 0x2f0   : > { %v742_v38 = vsel %vm740_vm5, %v739_v36, %v692_v5 }
 0x2f1   : > { %v768_v7 = vpop.permute.xlu0 %767 }
 0x2f2   : > { %v783_v27 = vsel %vm711_vm9, %v781_v24, %v768_v7 }
 0x2f3   : > { %v764_v12 = vpop.permute.xlu1 %763 }
 0x2f4   : > { %v782_v16 = vsel %vm166_vm1, %v780_v15, %v764_v12 }
 0x2f5   : > { %v702_v19 = vpop.permute.xlu0 %701 }
 0x2f6   : > { %v747_v21 = vsel %vm746_vm7, %v744_v14, %v702_v19 }
 0x2f7   : > { %787 = vst [vmem:[%s1272_s22] sm:$0xff] %v747_v21  ;;  %v698_v25 = vpop.permute.xlu1 %697 }
 0x2f8   : > { %v745_v39 = vsel %vm743_vm6, %v742_v38, %v698_v25 }
 0x2f9   : > { %v774_v28 = vpop.permute.xlu0 %773 }
 0x2fa   : > { %v785_v31 = vsel %vm177_vm2, %v783_v27, %v774_v28 }
 0x2fb   : > { %788 = vst.msk [vmem:[%s1272_s22 + $0x8] sm:$0xff] %vm716_vm10, %v785_v31  ;;  %v770_v33 = vpop.permute.xlu1 %769 }
 0x2fc   : > { %v784_v35 = vsel %vm711_vm9, %v782_v16, %v770_v33 }
 0x2ff   : > { %v704_v40 = vpop.permute.xlu1 %703 }
 0x300   : > { %v748_v42 = vsel %vm746_vm7, %v745_v39, %v704_v40 }
 0x301   : > { %789 = vst [vmem:[%s1272_s22 + $0x10] sm:$0xff] %v748_v42 }
 0x303   : > { %v776_v44 = vpop.permute.xlu1 %775 }
 0x304   : > { %v786_v41 = vsel %vm177_vm2, %v784_v35, %v776_v44 }
 0x305   : > { %790 = vst.msk [vmem:[%s1272_s22 + $0x18] sm:$0xff] %vm716_vm10, %v786_v41 }
 0x306   : > { %986 = shalt.err (!%p983_p3)
}
 0x307   : > { %s987_s5 = scalar_lea.hbm %s1302_s28, 512  ;;  %s991_s8 = scalar_lea.hbm %s1353_s2, 2048 }
 0x308   : > { %p988_p4 = scmp.ne.s32.totalorder %s1302_s28, %s987_s5  ;;  %p992_p9 = scmp.lt.u32.totalorder %s1302_s28, %s1353_s2 }
 0x309   : > { %p993_p10 = scmp.lt.u32.totalorder %s991_s8, %s987_s5  ;;  %p995_p12 = scmp.lt.u32.totalorder %s987_s5, %s1302_s28 }
 0x30a   : > { %p989_p7 = pnand %p988_p4, %p1109_p5 }
 0x30b   : > { %p994_p11 = por %p993_p10, %p992_p9 }
 0x30c   : > { %p990_p8 = pneg %p989_p7 }
 0x30d   : > { %p996_p13 = por %p995_p12, %p994_p11 }
 0x30f   : > { %p997_p0 = pnand %p996_p13, %p990_p8 }
 0x311   : > { %1000 = shalt.err (!%p997_p0)
}
 0x312   : > { %s1055_s17 = smov 256  }
 0x313   : > { %908 = dma.vmem_to_hbm [thread:$0]  (%p1109_p5), %s1296_s23, 512, %s1302_s28, %s1309_s13, %s1055_s17, %s1055_s17, %s1038_s27  }
 0x314 PF: > { %p914_p1 = scmp.ge.s32.totalorder %s1035_s12, 2  ;;  %s821_s21 = sand.u32 1, %s1023_s9  }
 0x315   : > { %s822_s22 = scalar_lea.sflag [#allocation3], %s821_s21 }
 0x316   : > { %p911_p2 = pnand %p914_p1, %p1113_p6 }
 0x318   : > { %1018 = dma.done.wait (!%p911_p2), %s822_s22, 512  }
 0x319   : > { %1020 = vsyncadd (!%p911_p2), %s822_s22, 4294966784  ;;  %p12_p3 = scmp.ge.s32.totalorder %s1096_s15, 6   ;;  %s1356_s9 = smov %s1027_s10 }
 0x31a   : > { %s1357_s10 = smov %s1031_s11  ;;  %s1358_s11 = smov %s1107_s18 }
 0x31b   : > { %s1359_s12 = smov %s1096_s15  ;;  %14 = sbr.rel (!%p12_p3) target bundleno = 3 (0x3), region = 63 }
 0x322   :  { %827 = vsyncpa [#allocation3], 1 }
 0x323   :  { %829 = vsyncpa [#allocation3 + $0x1], 1 }

</bundles_post_ra>
